<compile_context>
chip_gen: v7x
topology: tpu7x:2x2x1
jax: 0.10.0
libtpu: 0.0.40
codegen_flags: <defaults>
</compile_context>

<pallas_src>
import functools

import jax
import jax.numpy as jnp
from jax.experimental import pallas as pl
from jax.experimental.pallas import tpu as pltpu


def _round_up(x: int, m: int) -> int:
    return ((x + m - 1) // m) * m


def _cdiv(a: int, b: int) -> int:
    return (a + b - 1) // b


def _ce_kernel(logits_ref, tgt_ref, out_ref, *scratch,
               eps: float, num_classes: int, batch_size: int,
               smooth: bool, class_padded: bool, batch_padded: bool,
               single_class_tile: bool):
    i = pl.program_id(0)                       # batch-tile index ("parallel")
    x = logits_ref[...].astype(jnp.float32)    # (TB, TC), accumulate in f32
    tb, tc = x.shape

    # Local lane iota; target / validity become per-row shifted scalars.
    col = jax.lax.broadcasted_iota(jnp.int32, (tb, tc), 1)
    if single_class_tile:
        k_off = 0
    else:
        k = pl.program_id(1)                   # class-tile index ("arbitrary")
        k_off = k * tc

    tgt_local = tgt_ref[...] - k_off           # (TB, 1) int32
    match = col == tgt_local

    # Fused smoothed-target weights: w = (1-eps)*onehot + eps/C, sum_c w == 1.
    if smooth:
        w_hit = jnp.float32(1.0 - eps + eps / num_classes)
        w_miss = jnp.float32(eps / num_classes)
    else:
        w_hit = jnp.float32(1.0)
        w_miss = jnp.float32(0.0)
    w = jnp.where(match, w_hit, w_miss)

    if class_padded:
        # Mask out-of-range classes BEFORE anything reaches an accumulator so
        # garbage (incl. NaN bit patterns) from partial edge blocks is inert.
        valid = col < (num_classes - k_off)
        xv = jnp.where(valid, x, jnp.float32(-1e30))        # logsumexp input
        wx = jnp.where(valid, w * x, jnp.float32(0.0))      # weighted-sum input
    else:
        xv = x
        wx = w * x

    wx_row = jnp.sum(wx, axis=1, keepdims=True)             # (TB, 1)
    m_tile = jnp.max(xv, axis=1, keepdims=True)             # (TB, 1)

    def _finalize(lse, acc_rows):
        loss_rows = lse - acc_rows                          # sum_c w == 1
        if batch_padded:
            row = jax.lax.broadcasted_iota(jnp.int32, loss_rows.shape, 0) + i * tb
            loss_rows = jnp.where(row < batch_size, loss_rows, jnp.float32(0.0))
        # mean over batch folded in as one compile-time scalar multiply
        partial = jnp.sum(loss_rows) * jnp.float32(1.0 / batch_size)
        out_ref[...] = jnp.zeros(out_ref.shape, jnp.float32) + partial

    if single_class_tile:
        # Whole class axis in one tile: no online-LSE carry, no scratch.
        l_row = jnp.sum(jnp.exp(xv - m_tile), axis=1, keepdims=True)
        _finalize(m_tile + jnp.log(l_row), wx_row)
    else:
        m_ref, l_ref, acc_ref = scratch
        nk = pl.num_programs(1)

        @pl.when(k == 0)
        def _():
            m_ref[...] = jnp.full(m_ref.shape, -1e30, jnp.float32)
            l_ref[...] = jnp.zeros(l_ref.shape, jnp.float32)
            acc_ref[...] = jnp.zeros(acc_ref.shape, jnp.float32)

        # online logsumexp over class tiles (flash-style)
        m_prev = m_ref[...]
        m_new = jnp.maximum(m_prev, m_tile)
        alpha = jnp.exp(m_prev - m_new)
        l_ref[...] = alpha * l_ref[...] + jnp.sum(jnp.exp(xv - m_new),
                                                  axis=1, keepdims=True)
        m_ref[...] = m_new
        acc_ref[...] = acc_ref[...] + wx_row

        @pl.when(k == nk - 1)
        def _():
            _finalize(m_ref[...] + jnp.log(l_ref[...]), acc_ref[...])


def cross_entropy_label_smooth(logits, targets, *, epsilon=0.1,
                               use_label_smoothing=True,
                               block_b=None, block_c=None):
    """logits: (B, C) float (f32 or bf16); targets: (B,) int class indices."""
    b, c = logits.shape
    itemsize = jnp.dtype(logits.dtype).itemsize

    # Batch tile: multiple of 16 (bf16 sublane packing); aim for >=2 batch tiles
    # so v7x's two TensorCores both get work; cap at 256 rows.
    if block_b is None:
        block_b = min(256, _round_up(max(_cdiv(b, 2), 1), 16))
    else:
        block_b = _round_up(int(block_b), 16)
    block_b = min(block_b, _round_up(b, 16))

    # Class tile: take the whole class axis in one contiguous DMA when the tile
    # stays <= ~4 MiB (drops the online-LSE carry entirely); else lane-aligned
    # 4096-wide tiles (~4 MiB f32 at block_b=256, safe on v7x's 64 MiB VMEM).
    if block_c is None:
        if block_b * c * itemsize <= (4 << 20):
            block_c = c
        else:
            block_c = 4096
    else:
        block_c = _round_up(int(block_c), 128)
        if block_c >= c:
            block_c = c

    nbt = _cdiv(b, block_b)
    nct = _cdiv(c, block_c)
    class_padded = (c % block_c) != 0
    batch_padded = (b % block_b) != 0
    single = (nct == 1)

    eps_eff = float(epsilon) if use_label_smoothing else 0.0
    kernel = functools.partial(
        _ce_kernel,
        eps=eps_eff,
        num_classes=int(c),
        batch_size=int(b),
        smooth=(eps_eff != 0.0),
        class_padded=class_padded,
        batch_padded=batch_padded,
        single_class_tile=single,
    )

    targets_2d = targets.astype(jnp.int32).reshape(b, 1)

    if single:
        grid = (nbt,)
        in_specs = [pl.BlockSpec((block_b, block_c), lambda i: (i, 0)),
                    pl.BlockSpec((block_b, 1), lambda i: (i, 0))]
        out_specs = pl.BlockSpec((1, 1, 128), lambda i: (i, 0, 0))
        scratch = []
        dim_sem = ("parallel",)
    else:
        grid = (nbt, nct)
        in_specs = [pl.BlockSpec((block_b, block_c), lambda i, k: (i, k)),
                    pl.BlockSpec((block_b, 1), lambda i, k: (i, 0))]
        out_specs = pl.BlockSpec((1, 1, 128), lambda i, k: (i, 0, 0))
        scratch = [pltpu.VMEM((block_b, 1), jnp.float32)] * 3
        dim_sem = ("parallel", "arbitrary")

    cost = pl.CostEstimate(
        flops=int(5 * b * c),
        transcendentals=int(b * c),
        bytes_accessed=int(b * c * itemsize + b * 4 + nbt * 128 * 4),
    )

    partials = pl.pallas_call(
        kernel,
        out_shape=jax.ShapeDtypeStruct((nbt, 1, 128), jnp.float32),
        grid_spec=pltpu.PrefetchScalarGridSpec(
            num_scalar_prefetch=0,
            grid=grid,
            in_specs=in_specs,
            out_specs=out_specs,
            scratch_shapes=scratch),
        compiler_params=pltpu.CompilerParams(
            dimension_semantics=dim_sem,
            vmem_limit_bytes=48 << 20),
        cost_estimate=cost,
    )(logits, targets_2d)

    # per-batch-tile partial losses -> final scalar
    return jnp.sum(partials[:, 0, 0])


def _reference(logits, targets, epsilon=0.1, use_label_smoothing=True):
    b, c = logits.shape
    log_probs = jax.nn.log_softmax(logits.astype(jnp.float32), axis=1)
    onehot = jax.nn.one_hot(targets, c, dtype=jnp.float32)
    if use_label_smoothing:
        onehot = (1.0 - epsilon) * onehot + epsilon / c
    return jnp.sum(jnp.mean(-onehot * log_probs, axis=0))


if __name__ == "__main__":
    key = jax.random.PRNGKey(0)
    k1, k2, k3, k4 = jax.random.split(key, 4)

    # 1) small (batch, num_classes) case matching the module's forward, f32.
    #    -> single class tile fast path, partial batch block (no wrapper pad).
    b1, c1 = 8, 32
    logits1 = jax.random.normal(k1, (b1, c1), dtype=jnp.float32)
    targets1 = jax.random.randint(k2, (b1,), 0, c1, dtype=jnp.int32)
    out1 = jax.block_until_ready(
        cross_entropy_label_smooth(logits1, targets1, epsilon=0.1,
                                   use_label_smoothing=True))
    ref1 = _reference(logits1, targets1, 0.1, True)
    assert jnp.allclose(out1, ref1, rtol=1e-5, atol=1e-5), (out1, ref1)

    # 2) ragged shapes: multi-tile online-LSE over classes + partial edge blocks
    #    in both batch and class dims (masks exercised), 2 batch tiles.
    b2, c2 = 20, 300
    logits2 = jax.random.normal(k3, (b2, c2), dtype=jnp.float32) * 3.0
    targets2 = jax.random.randint(k4, (b2,), 0, c2, dtype=jnp.int32)
    out2 = jax.block_until_ready(
        cross_entropy_label_smooth(logits2, targets2, epsilon=0.1,
                                   use_label_smoothing=True,
                                   block_b=16, block_c=128))
    ref2 = _reference(logits2, targets2, 0.1, True)
    assert jnp.allclose(out2, ref2, rtol=1e-5, atol=1e-5), (out2, ref2)

    # 3) bf16 logits streamed directly (f32 accumulation inside the kernel).
    out3 = jax.block_until_ready(
        cross_entropy_label_smooth(logits2.astype(jnp.bfloat16), targets2,
                                   epsilon=0.1, use_label_smoothing=True,
                                   block_b=16, block_c=128))
    ref3 = _reference(logits2.astype(jnp.bfloat16).astype(jnp.float32),
                      targets2, 0.1, True)
    assert jnp.allclose(out3, ref3, rtol=2e-2, atol=2e-2), (out3, ref3)

    # 4) default tiling on the ragged case: single class tile, 2 batch tiles.
    out4 = jax.block_until_ready(
        cross_entropy_label_smooth(logits2, targets2, epsilon=0.1,
                                   use_label_smoothing=True))
    assert jnp.allclose(out4, ref2, rtol=1e-5, atol=1e-5), (out4, ref2)

    # 5) no label smoothing path (plain CE).
    out5 = jax.block_until_ready(
        cross_entropy_label_smooth(logits1, targets1, epsilon=0.1,
                                   use_label_smoothing=False))
    ref5 = _reference(logits1, targets1, 0.1, False)
    assert jnp.allclose(out5, ref5, rtol=1e-5, atol=1e-5), (out5, ref5)

    print("KERNEL_OK")
</pallas_src>

<mosaic_0001>
module attributes {stable_mosaic.version = 11 : i64} {
  func.func @_ce_kernel(%arg0: i32, %arg1: memref<16x32xf32, #tpu.memory_space<vmem>>, %arg2: memref<16x1xi32, #tpu.memory_space<vmem>>, %arg3: memref<1x1x128xf32, #tpu.memory_space<vmem>>) attributes {dimension_semantics = [#tpu.dimension_semantics<parallel>], iteration_bounds = array<i64: 1>, scalar_prefetch = 0 : i64, scratch_operands = 0 : i64, tpu.core_type = #tpu.core_type<tc>, window_params = [{transform_indices = @transform_0, window_bounds = array<i64: 16, 32>}, {transform_indices = @transform_1, window_bounds = array<i64: 16, 1>}, {transform_indices = @transform_2, window_bounds = array<i64: 1, 1, 128>}]} {
    %c0 = arith.constant 0 : index
    %c0_0 = arith.constant 0 : index
    %0 = vector.load %arg1[%c0, %c0_0] : memref<16x32xf32, #tpu.memory_space<vmem>>, vector<16x32xf32>
    %1 = tpu.iota {dimensions = array<i32: 1>} : vector<16x32xi32>
    %c0_1 = arith.constant 0 : index
    %c0_2 = arith.constant 0 : index
    %2 = vector.load %arg2[%c0_1, %c0_2] : memref<16x1xi32, #tpu.memory_space<vmem>>, vector<16x1xi32>
    %c0_i32 = arith.constant 0 : i32
    %3 = vector.broadcast %c0_i32 : i32 to vector<16x1xi32>
    %4 = arith.subi %2, %3 : vector<16x1xi32>
    %5 = vector.broadcast %4 : vector<16x1xi32> to vector<16x32xi32>
    %6 = arith.cmpi eq, %1, %5 : vector<16x32xi32>
    %cst = arith.constant 0.903124988 : f32
    %cst_3 = arith.constant 3.125000e-03 : f32
    %7 = vector.broadcast %cst : f32 to vector<16x32xf32>
    %8 = vector.broadcast %cst_3 : f32 to vector<16x32xf32>
    %9 = arith.select %6, %7, %8 : vector<16x32xi1>, vector<16x32xf32>
    %10 = arith.mulf %9, %0 : vector<16x32xf32>
    %cst_4 = arith.constant dense<0.000000e+00> : vector<16xf32>
    %11 = vector.multi_reduction <add>, %10, %cst_4 [1] : vector<16x32xf32> to vector<16xf32>
    %12 = vector.shape_cast %11 : vector<16xf32> to vector<16x1xf32>
    %cst_5 = arith.constant dense<0xFF800000> : vector<16xf32>
    %13 = vector.multi_reduction <maximumf>, %0, %cst_5 [1] : vector<16x32xf32> to vector<16xf32>
    %14 = vector.shape_cast %13 : vector<16xf32> to vector<16x1xf32>
    %15 = vector.broadcast %14 : vector<16x1xf32> to vector<16x32xf32>
    %16 = arith.subf %0, %15 : vector<16x32xf32>
    %17 = math.exp %16 : vector<16x32xf32>
    %cst_6 = arith.constant dense<0.000000e+00> : vector<16xf32>
    %18 = vector.multi_reduction <add>, %17, %cst_6 [1] : vector<16x32xf32> to vector<16xf32>
    %19 = vector.shape_cast %18 : vector<16xf32> to vector<16x1xf32>
    %20 = math.log %19 : vector<16x1xf32>
    %21 = arith.addf %14, %20 : vector<16x1xf32>
    %22 = arith.subf %21, %12 : vector<16x1xf32>
    %23 = tpu.iota {dimensions = array<i32: 0>} : vector<16x1xi32>
    %c16_i32 = arith.constant 16 : i32
    %24 = arith.muli %arg0, %c16_i32 : i32
    %25 = vector.broadcast %24 : i32 to vector<16x1xi32>
    %26 = arith.addi %23, %25 : vector<16x1xi32>
    %c8_i32 = arith.constant 8 : i32
    %27 = vector.broadcast %c8_i32 : i32 to vector<16x1xi32>
    %28 = arith.cmpi slt, %26, %27 : vector<16x1xi32>
    %cst_7 = arith.constant 0.000000e+00 : f32
    %29 = vector.broadcast %cst_7 : f32 to vector<16x1xf32>
    %30 = arith.select %28, %22, %29 : vector<16x1xi1>, vector<16x1xf32>
    %31 = vector.shape_cast %30 : vector<16x1xf32> to vector<1x16x1xf32>
    %cst_8 = arith.constant dense<0.000000e+00> : vector<1xf32>
    %32 = vector.multi_reduction <add>, %31, %cst_8 [1, 2] : vector<1x16x1xf32> to vector<1xf32>
    %33 = vector.shape_cast %32 : vector<1xf32> to vector<1x1x1xf32>
    %34 = vector.extract %33[0, 0, 0] : f32 from vector<1x1x1xf32>
    %cst_9 = arith.constant 1.250000e-01 : f32
    %35 = arith.mulf %34, %cst_9 : f32
    %cst_10 = arith.constant 0.000000e+00 : f32
    %36 = vector.broadcast %cst_10 : f32 to vector<1x1x128xf32>
    %37 = vector.broadcast %35 : f32 to vector<1x1x128xf32>
    %38 = arith.addf %36, %37 : vector<1x1x128xf32>
    %c0_11 = arith.constant 0 : index
    %c0_12 = arith.constant 0 : index
    %c0_13 = arith.constant 0 : index
    %39 = vector.load %arg3[%c0_11, %c0_12, %c0_13] : memref<1x1x128xf32, #tpu.memory_space<vmem>>, vector<1x1x128xf32>
    tpu.vector_store %arg3[%c0_11, %c0_12, %c0_13], %38 {strides = array<i32>} : memref<1x1x128xf32, #tpu.memory_space<vmem>>, vector<1x1x128xf32>,
    return
  }
  func.func @transform_0(%arg0: i32) -> (i32, i32) {
    %c0_i32 = arith.constant 0 : i32
    %c0_i32_0 = arith.constant 0 : i32
    return %arg0, %c0_i32 : i32, i32
  }
  func.func @transform_1(%arg0: i32) -> (i32, i32) {
    %c0_i32 = arith.constant 0 : i32
    %c0_i32_0 = arith.constant 0 : i32
    return %arg0, %c0_i32 : i32, i32
  }
  func.func @transform_2(%arg0: i32) -> (i32, i32, i32) {
    %c0_i32 = arith.constant 0 : i32
    %c0_i32_0 = arith.constant 0 : i32
    %c0_i32_1 = arith.constant 0 : i32
    return %arg0, %c0_i32, %c0_i32_0 : i32, i32, i32
  }
}

</mosaic_0001>

<bundles_post_ra>
// kernel: tpu_custom_call.1
= control target key start
LH: loop header
LB: loop body
LE: loop exit
PB: predicated region body
PF: predicated region fallthrough
CT: control target
= control target key end

     0   :  { %vm30_vm0 = vcmask 261120   ;;  %s178_s0 = inlined_call_operand.vmem [shape: f32[8,32], index: 0, kind: input, shape index: {}]   ;;  %s179_s1 = inlined_call_operand.vmem [shape: s32[8,1], index: 1, kind: input, shape index: {}]   ;;  %s180_s2 = inlined_call_operand.hbm [shape: f32[1,1,128], index: 2, kind: output, shape index: {}]  }
   0x1   :  { %v12_v0 = vld [vmem:[%s178_s0] sm:$0xff] }
   0x2   :  { %7 = vsyncpa [#allocation3], 0  ;;  %v37_v1 = vsel %vm30_vm0, %v12_v0, -inf  ;;  %v139_v2 = vmov 0   ;;  %v16_v3 = vld [vmem:[%s179_s1] sm:$0xff]  ;;  %v14_v6 = vlaneseq  ;;  %vm74_vm2 = vcmask 7168  }
   0x3   :  { %110 = vset.pattern.permute.xlu0 %v139_v2  ;;  %v140_v10 = vmov 0.003125   ;;  %s141_s0 = smov [#allocation2]  }
   0x4   :  { %38 = vmax.xlane.f32.xlu0 %v37_v1  ;;  %v15_v8 = vand.u32 127, %v14_v6  ;;  %s97_s1 = sshll.u32 %s141_s0, 4  ;;  %s98_s1 = int_to_ptr.vmem [resolvable:$true] %s97_s1 }
   0x5   :  { %s115_s15 = scalar_lea.vmem %s98_s1, 16  ;;  %s119_s16 = scalar_lea.vmem %s98_s1, 32 }
   0x6   :  { %p116_p0 = scmp.ne.s32.totalorder %s98_s1, %s115_s15  ;;  %p120_p1 = scmp.lt.s32.totalorder %s98_s1, %s98_s1 }
   0x7   :  { %p121_p2 = scmp.lt.s32.totalorder %s119_s16, %s115_s15 }
   0x9   :  { %p122_p3 = por %p121_p2, %p120_p1 }
   0xb   :  { %p123_p4 = pnand %p122_p3, %p116_p0 }
  0x1a   :  { %19 = vperm.xlu0 %110, %v16_v3  }
  0x91   :  { %v39_v4 = vpop.xlane.xlu0 %38 }
  0x92   :  { %v43_v5 = vsub.f32 %v12_v0, %v39_v4 }
  0x94   :  { %v45_v7 = vmul.f32 1.442695, %v43_v5 }
  0x96   :  { %111 = vpow2.f32 %v45_v7 }
  0x99   :  { %v20_v9 = vpop.permute.xlu0 %19 }
  0x9a   :  { %vm24_vm1 = vcmp.eq.s32.totalorder %v15_v8, %v20_v9 }
  0x9b   :  { %v26_v11 = vsel %vm24_vm1, 0.903125, %v140_v10 }
  0x9c   :  { %v28_v12 = vmul.f32 %v26_v11, %v12_v0 }
  0x9e   :  { %v31_v15 = vsel %vm30_vm0, %v28_v12, 0.0 }
  0xa0   :  { %v112_v13 = vpop.eup %111 }
  0xa1   :  { %v49_v14 = vsel %vm30_vm0, %v112_v13, 0.0 }
  0xa2   :  { %50 = vadd.xlane.f32.xlu1 %v49_v14 }
  0xa6   :  { %32 = vadd.xlane.f32.xlu1 %v31_v15 }
 0x12f   :  { %v51_v16 = vpop.xlane.xlu1 %50 }
 0x130   :  { %113 = vlog2.f32 %v51_v16 }
 0x133   :  { %v33_v19 = vpop.xlane.xlu1 %32 }
 0x13a   :  { %v114_v17 = vpop.eup %113 }
 0x13b   :  { %v56_v18 = vmul.f32 0.6931472, %v114_v17 }
 0x13d   :  { %v59_v20 = vadd.f32 %v56_v18, %v39_v4 }
 0x13f   :  { %v61_v21 = vsub.f32 %v59_v20, %v33_v19 }
 0x141   :  { %v75_v22 = vsel %vm74_vm2, %v61_v21, 0.0 }
 0x142   :  { %78 = vadd.xlane.f32.xlu1 %v75_v22 }
 0x1cf   :  { %v79_v23 = vpop.xlane.xlu1 %78 }
 0x1d0   :  { %v80_v24 = vrot.slane %v79_v23, 4 }
 0x1d2   :  { %v81_v25 = vadd.f32 %v80_v24, %v79_v23 }
 0x1d4   :  { %v82_v26 = vrot.slane %v81_v25, 2 }
 0x1d6   :  { %v83_v27 = vadd.f32 %v82_v26, %v81_v25 }
 0x1d8   :  { %v84_v28 = vrot.slane %v83_v27, 1 }
 0x1da   :  { %v85_v29 = vadd.f32 %v84_v28, %v83_v27 }
 0x1dc   :  { %105 = vpush %v85_v29 }
 0x20d   :  { %s106_s13 = spop %105 }
 0x20e   :  { %s87_s14 = smul.f32 0.125, %s106_s13 }
 0x210   :  { %v88_v30 = vstv %s87_s14 }
 0x211   :  { %90 = vst [vmem:[#allocation2] sm:$0x1] %v88_v30 }
 0x212   :  { %126 = shalt.err (!%p123_p4)
}
 0x213   :  { %s127_s19 = scalar_lea.hbm %s180_s2, 16 }
 0x214   :  { %p128_p5 = scmp.ne.s32.totalorder %s180_s2, %s127_s19  ;;  %p131_p6 = scmp.lt.u32.totalorder %s127_s19, %s180_s2 }
 0x216   :  { %p133_p7 = pnand %p131_p6, %p128_p5 }
 0x218   :  { %136 = shalt.err (!%p133_p7)
}
 0x219   :  { %100 = dma.vmem_to_hbm [thread:$0]  %s98_s1, 16, %s180_s2, [#allocation3]  }
 0x21a   :  { %137 = dma.done.wait [#allocation3], 16  }
 0x21b   :  { %138 = vsyncadd [#allocation3], 4294967280 }
 0x21c   :  { %104 = vsyncpa [#allocation3], 1 }

</bundles_post_ra>
